<compile_context>
chip_gen: v5e
topology: v5e:2x2
jax: 0.10.0
libtpu: 0.0.40
codegen_flags: <defaults>
</compile_context>

<pallas_src>
import jax
import jax.numpy as jnp
from jax import lax
from jax.experimental import pallas as pl
from jax.experimental.pallas import tpu as pltpu


# ----------------------------------------------------------------------------
# BN folding (training-mode batch stats, single pass over x)
# ----------------------------------------------------------------------------
def _fold_bn(x_nchw, gamma, beta, eps):
    ex = jnp.mean(x_nchw, axis=(0, 2, 3))
    ex2 = jnp.mean(x_nchw * x_nchw, axis=(0, 2, 3))
    var = ex2 - ex * ex                       # biased variance (BN training mode)
    scale = gamma / jnp.sqrt(var + eps)
    shift = beta - ex * scale
    return scale, shift


# ----------------------------------------------------------------------------
# Fused BN + sign + conv(3x3, pad 1) + bias + maxpool(2,2) Pallas kernel
# ----------------------------------------------------------------------------
def bin_conv2d(x_nchw, conv_w, conv_b, gamma, beta, *, eps=1e-5):
    x_nchw = x_nchw.astype(jnp.float32)
    N, C, H, W = x_nchw.shape
    Cout, Cin, KH, KW = conv_w.shape
    assert Cin == C and KH == 3 and KW == 3, "module defaults: 3x3, stride 1, pad 1"
    assert H % 2 == 0 and W % 2 == 0
    Ho, Wo = H // 2, W // 2
    WpC = (W + 2) * C                         # lane width of the padded image rows

    # --- BN folded to per-channel scale/shift (one pass over x; tiny XLA glue)
    scale, shift = _fold_bn(x_nchw, gamma, beta, eps)

    # --- NCHW -> NHWC, zero-pad H/W by 1, merge (W+2, C) into the lane dim.
    #     (pure layout plumbing; the 9x im2col blow-up never exists in HBM)
    x_nhwc = jnp.transpose(x_nchw, (0, 2, 3, 1))
    xp = jnp.pad(x_nhwc, ((0, 0), (1, 1), (1, 1), (0, 0)))
    xp = xp.reshape(N, H + 2, WpC)

    # --- Per-lane BN params, zeroed at padded columns so BN+sign(pad) == 0
    #     (PyTorch zero-pads AFTER binarization).  Padded rows are masked in-kernel.
    col_valid = jnp.pad(jnp.ones((W, C), jnp.float32), ((1, 1), (0, 0))).reshape(1, WpC)
    scale_l = jnp.tile(scale, W + 2).reshape(1, WpC).astype(jnp.float32) * col_valid
    shift_l = jnp.tile(shift, W + 2).reshape(1, WpC).astype(jnp.float32) * col_valid

    # --- Conv weights kron-expanded so each 3x3 tap is ONE lane-dense matmul:
    #     Wexp[t, j*C+c, J*Cout+o] = W[o, c, kh, kw]  iff j == J   (t = kh*3+kw)
    wt = jnp.transpose(conv_w, (2, 3, 1, 0)).reshape(KH * KW, C, Cout)
    eye_w = jnp.eye(W, dtype=jnp.float32)
    wexp = jnp.einsum('jJ,tco->tjcJo', eye_w, wt).reshape(KH * KW, W * C, W * Cout)
    wexp = wexp.astype(jnp.bfloat16)          # bf16 MXU path; +-1/0 acts are exact
    b_lane = jnp.tile(conv_b, W).reshape(1, W * Cout).astype(jnp.float32)

    # --- Exact 0/1 selection matrices implementing the 2x2/2 max-pool as matmuls
    i_idx, r_idx = jnp.arange(H), jnp.arange(Ho)
    vsel = jnp.stack([(i_idx[None, :] == (2 * r_idx + d)[:, None]).astype(jnp.float32)
                      for d in (0, 1)])                         # (2, Ho, H)
    l_idx, m_idx = jnp.arange(W * Cout), jnp.arange(Wo * Cout)
    J, o = l_idx // Cout, l_idx % Cout
    q, o2 = m_idx // Cout, m_idx % Cout
    hsel = jnp.stack([((J[:, None] == (2 * q + d)[None, :]) &
                       (o[:, None] == o2[None, :])).astype(jnp.float32)
                      for d in (0, 1)])                         # (2, W*Cout, Wo*Cout)

    def kernel(x_ref, scale_ref, shift_ref, w_ref, b_ref, vsel_ref, hsel_ref, o_ref):
        # ---- fused BN + sign (lane-dense: (H+2, (W+2)*C)) ----
        xpad = x_ref[0]
        bn = xpad * scale_ref[...] + shift_ref[...]
        sgn = jnp.where(bn > 0, 1.0, jnp.where(bn < 0, -1.0, 0.0))   # torch.sign
        row = lax.broadcasted_iota(jnp.int32, bn.shape, 0)
        xb = jnp.where((row >= 1) & (row <= H), sgn, 0.0)            # zero pad rows

        # ---- conv as 9 lane-dense MXU matmuls over contiguous tap slices ----
        acc = jnp.zeros((H, W * Cout), jnp.float32)
        for t in range(KH * KW):
            kh, kw = divmod(t, KW)
            v = xb[kh:kh + H, C * kw:C * kw + C * W].astype(jnp.bfloat16)  # (H, W*C)
            acc = acc + jnp.dot(v, w_ref[t], preferred_element_type=jnp.float32)
        acc = acc + b_ref[...]                                        # (H, W*Cout)

        # ---- 2x2 max-pool = maximum of exact 0/1-selection matmuls ----
        vmax = jnp.maximum(
            jnp.dot(vsel_ref[0], acc, preferred_element_type=jnp.float32),
            jnp.dot(vsel_ref[1], acc, preferred_element_type=jnp.float32))
        o_ref[0] = jnp.maximum(
            jnp.dot(vmax, hsel_ref[0], preferred_element_type=jnp.float32),
            jnp.dot(vmax, hsel_ref[1], preferred_element_type=jnp.float32))

    out3 = pl.pallas_call(
        kernel,
        out_shape=jax.ShapeDtypeStruct((N, Ho, Wo * Cout), jnp.float32),
        grid=(N,),
        in_specs=[
            pl.BlockSpec((1, H + 2, WpC), lambda n: (n, 0, 0)),         # padded image
            pl.BlockSpec((1, WpC), lambda n: (0, 0)),                   # BN scale
            pl.BlockSpec((1, WpC), lambda n: (0, 0)),                   # BN shift
            pl.BlockSpec((KH * KW, W * C, W * Cout), lambda n: (0, 0, 0)),  # weights
            pl.BlockSpec((1, W * Cout), lambda n: (0, 0)),              # bias
            pl.BlockSpec((2, Ho, H), lambda n: (0, 0, 0)),              # vert pool sel
            pl.BlockSpec((2, W * Cout, Wo * Cout), lambda n: (0, 0, 0)),  # horiz pool sel
        ],
        out_specs=pl.BlockSpec((1, Ho, Wo * Cout), lambda n: (n, 0, 0)),
        compiler_params=pltpu.CompilerParams(dimension_semantics=("parallel",)),
    )(xp, scale_l, shift_l, wexp, b_lane, vsel, hsel)

    # (N, Ho, Wo*Cout) -> NCHW (tiny, layout plumbing only)
    return out3.reshape(N, Ho, Wo, Cout).transpose(0, 3, 1, 2)


# ----------------------------------------------------------------------------
# Pure-JAX reference (same math via lax.conv / reduce_window)
# ----------------------------------------------------------------------------
def bin_conv2d_reference(x_nchw, conv_w, conv_b, gamma, beta, *, eps=1e-5):
    scale, shift = _fold_bn(x_nchw, gamma, beta, eps)
    xb = jnp.sign(x_nchw * scale[None, :, None, None] + shift[None, :, None, None])
    y = lax.conv_general_dilated(
        xb, conv_w, window_strides=(1, 1), padding=((1, 1), (1, 1)),
        dimension_numbers=("NCHW", "OIHW", "NCHW"),
        precision=jax.lax.Precision.HIGHEST,
    ) + conv_b[None, :, None, None]
    y = lax.reduce_window(y, -jnp.inf, lax.max,
                          window_dimensions=(1, 1, 2, 2),
                          window_strides=(1, 1, 2, 2),
                          padding="VALID")
    return y


if __name__ == "__main__":
    # Small shapes consistent with the module: batch=2, in_channels=4,
    # spatial=16x16, out_channels=8.
    N, Cin, H, W, Cout = 2, 4, 16, 16, 8

    key = jax.random.PRNGKey(0)
    kx, kw, kb, kg, kbe = jax.random.split(key, 5)
    x = jax.random.normal(kx, (N, Cin, H, W), dtype=jnp.float32)
    conv_w = jax.random.normal(kw, (Cout, Cin, 3, 3), dtype=jnp.float32) * 0.1
    conv_b = jax.random.normal(kb, (Cout,), dtype=jnp.float32) * 0.1
    gamma = 1.0 + 0.1 * jax.random.normal(kg, (Cin,), dtype=jnp.float32)
    beta = 0.1 * jax.random.normal(kbe, (Cin,), dtype=jnp.float32)

    out = bin_conv2d(x, conv_w, conv_b, gamma, beta)
    out = jax.block_until_ready(out)
    assert out.shape == (N, Cout, H // 2, W // 2), out.shape

    # Tight check vs a reference using the same bf16-rounded conv weights
    # (kernel's only deliberate quantization; +-1/0 activations are exact).
    conv_w_bf = conv_w.astype(jnp.bfloat16).astype(jnp.float32)
    ref_bf = bin_conv2d_reference(x, conv_w_bf, conv_b, gamma, beta)
    assert jnp.allclose(out, ref_bf, rtol=2e-2, atol=2e-2), \
        float(jnp.max(jnp.abs(out - ref_bf)))

    # Coarser check vs the full-f32 reference (absorbs bf16 weight rounding).
    ref32 = bin_conv2d_reference(x, conv_w, conv_b, gamma, beta)
    assert jnp.allclose(out, ref32, rtol=5e-2, atol=5e-2), \
        float(jnp.max(jnp.abs(out - ref32)))

    print("KERNEL_OK")
</pallas_src>

<mosaic_0001>
module attributes {stable_mosaic.version = 11 : i64} {
  func.func @kernel(%arg0: i32, %arg1: memref<1x18x72xf32, #tpu.memory_space<vmem>>, %arg2: memref<1x72xf32, #tpu.memory_space<vmem>>, %arg3: memref<1x72xf32, #tpu.memory_space<vmem>>, %arg4: memref<9x64x128xbf16, #tpu.memory_space<vmem>>, %arg5: memref<1x128xf32, #tpu.memory_space<vmem>>, %arg6: memref<2x8x16xf32, #tpu.memory_space<vmem>>, %arg7: memref<2x128x64xf32, #tpu.memory_space<vmem>>, %arg8: memref<1x8x64xf32, #tpu.memory_space<vmem>>) attributes {dimension_semantics = [#tpu.dimension_semantics<parallel>], iteration_bounds = array<i64: 2>, scalar_prefetch = 0 : i64, scratch_operands = 0 : i64, tpu.core_type = #tpu.core_type<tc>, window_params = [{transform_indices = @transform_0, window_bounds = array<i64: 1, 18, 72>}, {pipeline_mode = #tpu.pipeline_mode<synchronous>, transform_indices = @transform_1, window_bounds = array<i64: 1, 72>}, {pipeline_mode = #tpu.pipeline_mode<synchronous>, transform_indices = @transform_2, window_bounds = array<i64: 1, 72>}, {pipeline_mode = #tpu.pipeline_mode<synchronous>, transform_indices = @transform_3, window_bounds = array<i64: 9, 64, 128>}, {pipeline_mode = #tpu.pipeline_mode<synchronous>, transform_indices = @transform_4, window_bounds = array<i64: 1, 128>}, {pipeline_mode = #tpu.pipeline_mode<synchronous>, transform_indices = @transform_5, window_bounds = array<i64: 2, 8, 16>}, {pipeline_mode = #tpu.pipeline_mode<synchronous>, transform_indices = @transform_6, window_bounds = array<i64: 2, 128, 64>}, {transform_indices = @transform_7, window_bounds = array<i64: 1, 8, 64>}]} {
    %c0 = arith.constant 0 : index
    %c0_0 = arith.constant 0 : index
    %c0_1 = arith.constant 0 : index
    %0 = vector.load %arg1[%c0, %c0_0, %c0_1] : memref<1x18x72xf32, #tpu.memory_space<vmem>>, vector<1x18x72xf32>
    %1 = vector.shape_cast %0 : vector<1x18x72xf32> to vector<18x72xf32>
    %c0_2 = arith.constant 0 : index
    %c0_3 = arith.constant 0 : index
    %2 = vector.load %arg2[%c0_2, %c0_3] : memref<1x72xf32, #tpu.memory_space<vmem>>, vector<1x72xf32>
    %3 = vector.broadcast %2 : vector<1x72xf32> to vector<18x72xf32>
    %4 = arith.mulf %1, %3 : vector<18x72xf32>
    %c0_4 = arith.constant 0 : index
    %c0_5 = arith.constant 0 : index
    %5 = vector.load %arg3[%c0_4, %c0_5] : memref<1x72xf32, #tpu.memory_space<vmem>>, vector<1x72xf32>
    %6 = vector.broadcast %5 : vector<1x72xf32> to vector<18x72xf32>
    %7 = arith.addf %4, %6 : vector<18x72xf32>
    %cst = arith.constant 0.000000e+00 : f32
    %8 = vector.broadcast %cst : f32 to vector<18x72xf32>
    %9 = arith.cmpf ogt, %7, %8 : vector<18x72xf32>
    %cst_6 = arith.constant 0.000000e+00 : f32
    %10 = vector.broadcast %cst_6 : f32 to vector<18x72xf32>
    %11 = arith.cmpf olt, %7, %10 : vector<18x72xf32>
    %cst_7 = arith.constant -1.000000e+00 : f32
    %cst_8 = arith.constant 0.000000e+00 : f32
    %12 = vector.broadcast %cst_7 : f32 to vector<18x72xf32>
    %13 = vector.broadcast %cst_8 : f32 to vector<18x72xf32>
    %14 = arith.select %11, %12, %13 : vector<18x72xi1>, vector<18x72xf32>
    %cst_9 = arith.constant 1.000000e+00 : f32
    %15 = vector.broadcast %cst_9 : f32 to vector<18x72xf32>
    %16 = arith.select %9, %15, %14 : vector<18x72xi1>, vector<18x72xf32>
    %17 = tpu.iota {dimensions = array<i32: 0>} : vector<18x72xi32>
    %c1_i32 = arith.constant 1 : i32
    %18 = vector.broadcast %c1_i32 : i32 to vector<18x72xi32>
    %19 = arith.cmpi sge, %17, %18 : vector<18x72xi32>
    %c16_i32 = arith.constant 16 : i32
    %20 = vector.broadcast %c16_i32 : i32 to vector<18x72xi32>
    %21 = arith.cmpi sle, %17, %20 : vector<18x72xi32>
    %22 = arith.andi %19, %21 : vector<18x72xi1>
    %cst_10 = arith.constant 0.000000e+00 : f32
    %23 = vector.broadcast %cst_10 : f32 to vector<18x72xf32>
    %24 = arith.select %22, %16, %23 : vector<18x72xi1>, vector<18x72xf32>
    %cst_11 = arith.constant 0.000000e+00 : f32
    %25 = vector.broadcast %cst_11 : f32 to vector<16x128xf32>
    %26 = vector.extract_strided_slice %24 {offsets = [0, 0], sizes = [16, 64], strides = [1, 1]} : vector<18x72xf32> to vector<16x64xf32>
    %27 = arith.truncf %26 : vector<16x64xf32> to vector<16x64xbf16>
    %c0_12 = arith.constant 0 : index
    %c0_13 = arith.constant 0 : index
    %c0_14 = arith.constant 0 : index
    %28 = vector.load %arg4[%c0_12, %c0_13, %c0_14] : memref<9x64x128xbf16, #tpu.memory_space<vmem>>, vector<1x64x128xbf16>
    %29 = vector.shape_cast %28 : vector<1x64x128xbf16> to vector<64x128xbf16>
    %cst_15 = arith.constant dense<0.000000e+00> : vector<16x128xf32>
    %30 = tpu.matmul %27, %29, %cst_15 {dimension_numbers = #tpu.dot_dimension_numbers<[1], [0], [0], [1], [0, 0, 1, 1], [], []>} : vector<16x64xbf16>, vector<64x128xbf16>, vector<16x128xf32> -> vector<16x128xf32>
    %31 = arith.addf %25, %30 : vector<16x128xf32>
    %32 = vector.extract_strided_slice %24 {offsets = [0, 4], sizes = [16, 64], strides = [1, 1]} : vector<18x72xf32> to vector<16x64xf32>
    %33 = arith.truncf %32 : vector<16x64xf32> to vector<16x64xbf16>
    %c1 = arith.constant 1 : index
    %c0_16 = arith.constant 0 : index
    %c0_17 = arith.constant 0 : index
    %34 = vector.load %arg4[%c1, %c0_16, %c0_17] : memref<9x64x128xbf16, #tpu.memory_space<vmem>>, vector<1x64x128xbf16>
    %35 = vector.shape_cast %34 : vector<1x64x128xbf16> to vector<64x128xbf16>
    %cst_18 = arith.constant dense<0.000000e+00> : vector<16x128xf32>
    %36 = tpu.matmul %33, %35, %cst_18 {dimension_numbers = #tpu.dot_dimension_numbers<[1], [0], [0], [1], [0, 0, 1, 1], [], []>} : vector<16x64xbf16>, vector<64x128xbf16>, vector<16x128xf32> -> vector<16x128xf32>
    %37 = arith.addf %31, %36 : vector<16x128xf32>
    %38 = vector.extract_strided_slice %24 {offsets = [0, 8], sizes = [16, 64], strides = [1, 1]} : vector<18x72xf32> to vector<16x64xf32>
    %39 = arith.truncf %38 : vector<16x64xf32> to vector<16x64xbf16>
    %c2 = arith.constant 2 : index
    %c0_19 = arith.constant 0 : index
    %c0_20 = arith.constant 0 : index
    %40 = vector.load %arg4[%c2, %c0_19, %c0_20] : memref<9x64x128xbf16, #tpu.memory_space<vmem>>, vector<1x64x128xbf16>
    %41 = vector.shape_cast %40 : vector<1x64x128xbf16> to vector<64x128xbf16>
    %cst_21 = arith.constant dense<0.000000e+00> : vector<16x128xf32>
    %42 = tpu.matmul %39, %41, %cst_21 {dimension_numbers = #tpu.dot_dimension_numbers<[1], [0], [0], [1], [0, 0, 1, 1], [], []>} : vector<16x64xbf16>, vector<64x128xbf16>, vector<16x128xf32> -> vector<16x128xf32>
    %43 = arith.addf %37, %42 : vector<16x128xf32>
    %44 = vector.extract_strided_slice %24 {offsets = [1, 0], sizes = [16, 64], strides = [1, 1]} : vector<18x72xf32> to vector<16x64xf32>
    %45 = arith.truncf %44 : vector<16x64xf32> to vector<16x64xbf16>
    %c3 = arith.constant 3 : index
    %c0_22 = arith.constant 0 : index
    %c0_23 = arith.constant 0 : index
    %46 = vector.load %arg4[%c3, %c0_22, %c0_23] : memref<9x64x128xbf16, #tpu.memory_space<vmem>>, vector<1x64x128xbf16>
    %47 = vector.shape_cast %46 : vector<1x64x128xbf16> to vector<64x128xbf16>
    %cst_24 = arith.constant dense<0.000000e+00> : vector<16x128xf32>
    %48 = tpu.matmul %45, %47, %cst_24 {dimension_numbers = #tpu.dot_dimension_numbers<[1], [0], [0], [1], [0, 0, 1, 1], [], []>} : vector<16x64xbf16>, vector<64x128xbf16>, vector<16x128xf32> -> vector<16x128xf32>
    %49 = arith.addf %43, %48 : vector<16x128xf32>
    %50 = vector.extract_strided_slice %24 {offsets = [1, 4], sizes = [16, 64], strides = [1, 1]} : vector<18x72xf32> to vector<16x64xf32>
    %51 = arith.truncf %50 : vector<16x64xf32> to vector<16x64xbf16>
    %c4 = arith.constant 4 : index
    %c0_25 = arith.constant 0 : index
    %c0_26 = arith.constant 0 : index
    %52 = vector.load %arg4[%c4, %c0_25, %c0_26] : memref<9x64x128xbf16, #tpu.memory_space<vmem>>, vector<1x64x128xbf16>
    %53 = vector.shape_cast %52 : vector<1x64x128xbf16> to vector<64x128xbf16>
    %cst_27 = arith.constant dense<0.000000e+00> : vector<16x128xf32>
    %54 = tpu.matmul %51, %53, %cst_27 {dimension_numbers = #tpu.dot_dimension_numbers<[1], [0], [0], [1], [0, 0, 1, 1], [], []>} : vector<16x64xbf16>, vector<64x128xbf16>, vector<16x128xf32> -> vector<16x128xf32>
    %55 = arith.addf %49, %54 : vector<16x128xf32>
    %56 = vector.extract_strided_slice %24 {offsets = [1, 8], sizes = [16, 64], strides = [1, 1]} : vector<18x72xf32> to vector<16x64xf32>
    %57 = arith.truncf %56 : vector<16x64xf32> to vector<16x64xbf16>
    %c5 = arith.constant 5 : index
    %c0_28 = arith.constant 0 : index
    %c0_29 = arith.constant 0 : index
    %58 = vector.load %arg4[%c5, %c0_28, %c0_29] : memref<9x64x128xbf16, #tpu.memory_space<vmem>>, vector<1x64x128xbf16>
    %59 = vector.shape_cast %58 : vector<1x64x128xbf16> to vector<64x128xbf16>
    %cst_30 = arith.constant dense<0.000000e+00> : vector<16x128xf32>
    %60 = tpu.matmul %57, %59, %cst_30 {dimension_numbers = #tpu.dot_dimension_numbers<[1], [0], [0], [1], [0, 0, 1, 1], [], []>} : vector<16x64xbf16>, vector<64x128xbf16>, vector<16x128xf32> -> vector<16x128xf32>
    %61 = arith.addf %55, %60 : vector<16x128xf32>
    %62 = vector.extract_strided_slice %24 {offsets = [2, 0], sizes = [16, 64], strides = [1, 1]} : vector<18x72xf32> to vector<16x64xf32>
    %63 = arith.truncf %62 : vector<16x64xf32> to vector<16x64xbf16>
    %c6 = arith.constant 6 : index
    %c0_31 = arith.constant 0 : index
    %c0_32 = arith.constant 0 : index
    %64 = vector.load %arg4[%c6, %c0_31, %c0_32] : memref<9x64x128xbf16, #tpu.memory_space<vmem>>, vector<1x64x128xbf16>
    %65 = vector.shape_cast %64 : vector<1x64x128xbf16> to vector<64x128xbf16>
    %cst_33 = arith.constant dense<0.000000e+00> : vector<16x128xf32>
    %66 = tpu.matmul %63, %65, %cst_33 {dimension_numbers = #tpu.dot_dimension_numbers<[1], [0], [0], [1], [0, 0, 1, 1], [], []>} : vector<16x64xbf16>, vector<64x128xbf16>, vector<16x128xf32> -> vector<16x128xf32>
    %67 = arith.addf %61, %66 : vector<16x128xf32>
    %68 = vector.extract_strided_slice %24 {offsets = [2, 4], sizes = [16, 64], strides = [1, 1]} : vector<18x72xf32> to vector<16x64xf32>
    %69 = arith.truncf %68 : vector<16x64xf32> to vector<16x64xbf16>
    %c7 = arith.constant 7 : index
    %c0_34 = arith.constant 0 : index
    %c0_35 = arith.constant 0 : index
    %70 = vector.load %arg4[%c7, %c0_34, %c0_35] : memref<9x64x128xbf16, #tpu.memory_space<vmem>>, vector<1x64x128xbf16>
    %71 = vector.shape_cast %70 : vector<1x64x128xbf16> to vector<64x128xbf16>
    %cst_36 = arith.constant dense<0.000000e+00> : vector<16x128xf32>
    %72 = tpu.matmul %69, %71, %cst_36 {dimension_numbers = #tpu.dot_dimension_numbers<[1], [0], [0], [1], [0, 0, 1, 1], [], []>} : vector<16x64xbf16>, vector<64x128xbf16>, vector<16x128xf32> -> vector<16x128xf32>
    %73 = arith.addf %67, %72 : vector<16x128xf32>
    %74 = vector.extract_strided_slice %24 {offsets = [2, 8], sizes = [16, 64], strides = [1, 1]} : vector<18x72xf32> to vector<16x64xf32>
    %75 = arith.truncf %74 : vector<16x64xf32> to vector<16x64xbf16>
    %c8 = arith.constant 8 : index
    %c0_37 = arith.constant 0 : index
    %c0_38 = arith.constant 0 : index
    %76 = vector.load %arg4[%c8, %c0_37, %c0_38] : memref<9x64x128xbf16, #tpu.memory_space<vmem>>, vector<1x64x128xbf16>
    %77 = vector.shape_cast %76 : vector<1x64x128xbf16> to vector<64x128xbf16>
    %cst_39 = arith.constant dense<0.000000e+00> : vector<16x128xf32>
    %78 = tpu.matmul %75, %77, %cst_39 {dimension_numbers = #tpu.dot_dimension_numbers<[1], [0], [0], [1], [0, 0, 1, 1], [], []>} : vector<16x64xbf16>, vector<64x128xbf16>, vector<16x128xf32> -> vector<16x128xf32>
    %79 = arith.addf %73, %78 : vector<16x128xf32>
    %c0_40 = arith.constant 0 : index
    %c0_41 = arith.constant 0 : index
    %80 = vector.load %arg5[%c0_40, %c0_41] : memref<1x128xf32, #tpu.memory_space<vmem>>, vector<1x128xf32>
    %81 = vector.broadcast %80 : vector<1x128xf32> to vector<16x128xf32>
    %82 = arith.addf %79, %81 : vector<16x128xf32>
    %c0_42 = arith.constant 0 : index
    %c0_43 = arith.constant 0 : index
    %c0_44 = arith.constant 0 : index
    %83 = vector.load %arg6[%c0_42, %c0_43, %c0_44] : memref<2x8x16xf32, #tpu.memory_space<vmem>>, vector<1x8x16xf32>
    %84 = vector.shape_cast %83 : vector<1x8x16xf32> to vector<8x16xf32>
    %cst_45 = arith.constant dense<0.000000e+00> : vector<8x128xf32>
    %85 = tpu.matmul %84, %82, %cst_45 {dimension_numbers = #tpu.dot_dimension_numbers<[1], [0], [0], [1], [0, 0, 1, 1], [], []>} : vector<8x16xf32>, vector<16x128xf32>, vector<8x128xf32> -> vector<8x128xf32>
    %c1_46 = arith.constant 1 : index
    %c0_47 = arith.constant 0 : index
    %c0_48 = arith.constant 0 : index
    %86 = vector.load %arg6[%c1_46, %c0_47, %c0_48] : memref<2x8x16xf32, #tpu.memory_space<vmem>>, vector<1x8x16xf32>
    %87 = vector.shape_cast %86 : vector<1x8x16xf32> to vector<8x16xf32>
    %cst_49 = arith.constant dense<0.000000e+00> : vector<8x128xf32>
    %88 = tpu.matmul %87, %82, %cst_49 {dimension_numbers = #tpu.dot_dimension_numbers<[1], [0], [0], [1], [0, 0, 1, 1], [], []>} : vector<8x16xf32>, vector<16x128xf32>, vector<8x128xf32> -> vector<8x128xf32>
    %89 = arith.maximumf %85, %88 : vector<8x128xf32>
    %c0_50 = arith.constant 0 : index
    %c0_51 = arith.constant 0 : index
    %c0_52 = arith.constant 0 : index
    %90 = vector.load %arg7[%c0_50, %c0_51, %c0_52] : memref<2x128x64xf32, #tpu.memory_space<vmem>>, vector<1x128x64xf32>
    %91 = vector.shape_cast %90 : vector<1x128x64xf32> to vector<128x64xf32>
    %cst_53 = arith.constant dense<0.000000e+00> : vector<8x64xf32>
    %92 = tpu.matmul %89, %91, %cst_53 {dimension_numbers = #tpu.dot_dimension_numbers<[1], [0], [0], [1], [0, 0, 1, 1], [], []>} : vector<8x128xf32>, vector<128x64xf32>, vector<8x64xf32> -> vector<8x64xf32>
    %c1_54 = arith.constant 1 : index
    %c0_55 = arith.constant 0 : index
    %c0_56 = arith.constant 0 : index
    %93 = vector.load %arg7[%c1_54, %c0_55, %c0_56] : memref<2x128x64xf32, #tpu.memory_space<vmem>>, vector<1x128x64xf32>
    %94 = vector.shape_cast %93 : vector<1x128x64xf32> to vector<128x64xf32>
    %cst_57 = arith.constant dense<0.000000e+00> : vector<8x64xf32>
    %95 = tpu.matmul %89, %94, %cst_57 {dimension_numbers = #tpu.dot_dimension_numbers<[1], [0], [0], [1], [0, 0, 1, 1], [], []>} : vector<8x128xf32>, vector<128x64xf32>, vector<8x64xf32> -> vector<8x64xf32>
    %96 = arith.maximumf %92, %95 : vector<8x64xf32>
    %c0_58 = arith.constant 0 : index
    %c0_59 = arith.constant 0 : index
    %c0_60 = arith.constant 0 : index
    %97 = vector.load %arg8[%c0_58, %c0_59, %c0_60] : memref<1x8x64xf32, #tpu.memory_space<vmem>>, vector<1x8x64xf32>
    %98 = vector.shape_cast %97 : vector<1x8x64xf32> to vector<8x64xf32>
    %99 = vector.shape_cast %96 : vector<8x64xf32> to vector<1x8x64xf32>
    tpu.vector_store %arg8[%c0_58, %c0_59, %c0_60], %99 {strides = array<i32>} : memref<1x8x64xf32, #tpu.memory_space<vmem>>, vector<1x8x64xf32>,
    return
  }
  func.func @transform_0(%arg0: i32) -> (i32, i32, i32) {
    %c0_i32 = arith.constant 0 : i32
    %c0_i32_0 = arith.constant 0 : i32
    %c0_i32_1 = arith.constant 0 : i32
    return %arg0, %c0_i32, %c0_i32_0 : i32, i32, i32
  }
  func.func @transform_1(%arg0: i32) -> (i32, i32) {
    %c0_i32 = arith.constant 0 : i32
    %c0_i32_0 = arith.constant 0 : i32
    %c0_i32_1 = arith.constant 0 : i32
    return %c0_i32, %c0_i32_0 : i32, i32
  }
  func.func @transform_2(%arg0: i32) -> (i32, i32) {
    %c0_i32 = arith.constant 0 : i32
    %c0_i32_0 = arith.constant 0 : i32
    %c0_i32_1 = arith.constant 0 : i32
    return %c0_i32, %c0_i32_0 : i32, i32
  }
  func.func @transform_3(%arg0: i32) -> (i32, i32, i32) {
    %c0_i32 = arith.constant 0 : i32
    %c0_i32_0 = arith.constant 0 : i32
    %c0_i32_1 = arith.constant 0 : i32
    %c0_i32_2 = arith.constant 0 : i32
    return %c0_i32, %c0_i32_0, %c0_i32_1 : i32, i32, i32
  }
  func.func @transform_4(%arg0: i32) -> (i32, i32) {
    %c0_i32 = arith.constant 0 : i32
    %c0_i32_0 = arith.constant 0 : i32
    %c0_i32_1 = arith.constant 0 : i32
    return %c0_i32, %c0_i32_0 : i32, i32
  }
  func.func @transform_5(%arg0: i32) -> (i32, i32, i32) {
    %c0_i32 = arith.constant 0 : i32
    %c0_i32_0 = arith.constant 0 : i32
    %c0_i32_1 = arith.constant 0 : i32
    %c0_i32_2 = arith.constant 0 : i32
    return %c0_i32, %c0_i32_0, %c0_i32_1 : i32, i32, i32
  }
  func.func @transform_6(%arg0: i32) -> (i32, i32, i32) {
    %c0_i32 = arith.constant 0 : i32
    %c0_i32_0 = arith.constant 0 : i32
    %c0_i32_1 = arith.constant 0 : i32
    %c0_i32_2 = arith.constant 0 : i32
    return %c0_i32, %c0_i32_0, %c0_i32_1 : i32, i32, i32
  }
  func.func @transform_7(%arg0: i32) -> (i32, i32, i32) {
    %c0_i32 = arith.constant 0 : i32
    %c0_i32_0 = arith.constant 0 : i32
    %c0_i32_1 = arith.constant 0 : i32
    return %arg0, %c0_i32, %c0_i32_0 : i32, i32, i32
  }
}

</mosaic_0001>

<bundles_post_ra>
// kernel: tpu_custom_call.1
= control target key start
LH: loop header
LB: loop body
LE: loop exit
PB: predicated region body
PF: predicated region fallthrough
CT: control target
= control target key end

     0   :  { %12 = vsyncpa [#allocation3], 0  ;;  %s1790_s0 = inlined_call_operand.vmem [shape: f32[2,18,72], index: 0, kind: input, shape index: {}]   ;;  %s1791_s1 = inlined_call_operand.vmem [shape: f32[1,72], index: 1, kind: input, shape index: {}]   ;;  %s1792_s2 = inlined_call_operand.vmem [shape: f32[1,72], index: 2, kind: input, shape index: {}]   ;;  %s1793_s3 = inlined_call_operand.vmem [shape: bf16[9,64,128], index: 3, kind: input, shape index: {}]   ;;  %s1794_s4 = inlined_call_operand.vmem [shape: f32[1,128], index: 4, kind: input, shape index: {}]   ;;  %s1795_s5 = inlined_call_operand.vmem [shape: f32[2,8,16], index: 5, kind: input, shape index: {}]   ;;  %s1796_s6 = inlined_call_operand.vmem [shape: f32[2,128,64], index: 6, kind: input, shape index: {}]   ;;  %s1797_s7 = inlined_call_operand.hbm [shape: f32[2,8,64], index: 7, kind: output, shape index: {}]  }
   0x1   :  { %14 = vsyncpa [#allocation3 + $0x1], 0  ;;  %s1461_s24 = smov 0   ;;  %s1463_s25 = smov 0  }
   0x2   :  { %s1465_s26 = smov 0   ;;  %s1467_s27 = smov 0  }
   0x3 LB: > { %s1482_s28 = sadd.s32 4294967295, %s1416_s27   ;;  %s1026_s29 = sadd.s32 4294967294, %s1416_s27   ;;  %s1416_s27 = sphi %s1467_s27, %s1803_s27   ;;  %s1412_s26 = sphi %s1465_s26, %s1802_s26   ;;  %s1408_s25 = sphi %s1463_s25, %s1801_s25   ;;  %s1404_s24 = sphi %s1461_s24, %s1800_s24  }
   0x4   : > { %s1486_s30 = sadd.s32 1, %s1416_s27   ;;  %s179_s8 = sadd.s32 1, %s1412_s26 }
   0x5   : > { %s176_s9 = ssub.s32 %s1416_s27, %s1486_s30  ;;  %p189_p0 = scmp.ne.s32.totalorder %s1412_s26, %s1408_s25 }
   0x6   : > { %p177_p1 = scmp.eq.s32.totalorder %s176_s9, 0  ;;  %p190_p2 = scmp.eq.s32.totalorder %s1482_s28, 1 }
   0x7   : > { %p195_p3 = scmp.ne.s32.totalorder %s1408_s25, %s1404_s24  ;;  %p196_p4 = scmp.eq.s32.totalorder %s1026_s29, 1 }
   0x8   : > { %s1497_s10 = scalar_select %p177_p1, %s1412_s26, %s179_s8  }
   0x9   : > { %p1499_p5 = por %p190_p2, %p189_p0  ;;  %p1503_p6 = por %p196_p4, %p195_p3 }
   0xa   : > { %p1029_p7 = scmp.ge.s32.totalorder %s1416_s27, 1  ;;  %p240_p8 = scmp.lt.s32.totalorder %s1416_s27, 3 }
   0xc   : > { %p241_p9 = pnand %p1029_p7, %p240_p8 }
   0xd   : > { %p272_p10 = scmp.lt.s32.totalorder (!%p241_p9), %s1482_s28, 1  ;;  %s1419_s14 = smov (!%p241_p9), 124  }
   0xe   : > { %244 = sbr.rel (%p241_p9) target bundleno = 600 (0x258), region = 48  ;;  %s1420_s15 = smov (!%p241_p9), 120  }
   0xf   : > { %s269_s9 = sand.u32 (!%p241_p9), 1, %s1408_s25   ;;  %s1374_s8 = scalar_lea.hbm (!%p241_p9), %s1797_s7, 16 }
  0x10   : > { %s952_s22 = scalar_lea.sflag (!%p241_p9), [#allocation3], %s269_s9 }
  0x13   : > { %v307_v0 = vlaneseq  ;;  %s273_s13 = scalar_select %p272_p10, %s1482_s28, 1  ;;  %v1279_v1 = vld [vmem:[%s1793_s3 + $0x38] sm:$0xff]  ;;  %v1351_v3 = vld [vmem:[%s1791_s1] ss:$0 sm:$0xff]  ;;  %v1278_v4 = vld [vmem:[%s1793_s3 + $0x30] sm:$0xff]  ;;  %v1418_v24 = vmov 0.0  }
  0x14   : > { %v1287_v2 = vld [vmem:[%s1793_s3 + $0x78] sm:$0xff]  ;;  %376 = vmatpush.bf16.msra.mxu1 %v1279_v1  ;;  %v1286_v7 = vld [vmem:[%s1793_s3 + $0x70] sm:$0xff]  ;;  %v1352_v9 = vld [vmem:[%s1792_s2] ss:$0 sm:$0xff]  ;;  %vm491_vm8 = vsmask.f32 7424 }
  0x15   : > { %s1308_s18 = smul.u32 24, %s273_s13  ;;  %v1283_v5 = vld [vmem:[%s1793_s3 + $0x58] sm:$0xff]  ;;  %v308_v6 = vshrl.u32 %v307_v0, 7  ;;  %534 = vmatpush.bf16.msra.mxu3 %v1287_v2  ;;  %v1282_v10 = vld [vmem:[%s1793_s3 + $0x50] sm:$0xff]  ;;  %v1277_v18 = vld [vmem:[%s1793_s3 + $0x28] sm:$0xff]  ;;  %vm664_vm9 = vcmask 1046528  }
  0x16   : > { %v1291_v8 = vld [vmem:[%s1793_s3 + $0x98] sm:$0xff]  ;;  %469 = vmatpush.bf16.msra.mxu2 %v1283_v5  ;;  %v1285_v19 = vld [vmem:[%s1793_s3 + $0x68] sm:$0xff]  ;;  %v1276_v23 = vld [vmem:[%s1793_s3 + $0x20] sm:$0xff]  ;;  %vm368_vm10 = vcmask 523264   ;;  %vm826_vm11 = vcmask 130048   ;;  %s1030_s13 = sshll.u32 %s269_s9, 3 }
  0x17   : > { %s276_s17 = scalar_lea.vmem %s1790_s0, %s1308_s18  ;;  %v310_v14 = vadd.s32 16, %v308_v6  ;;  %588 = vmatpush.bf16.msra.mxu0 %v1291_v8  ;;  %vm311_vm0 = vcmp.ge.s32.totalorder %v308_v6, 1  ;;  %v1275_v45 = vld [vmem:[%s1793_s3 + $0x18] sm:$0xff]  ;;  %v1281_v46 = vld [vmem:[%s1793_s3 + $0x48] sm:$0xff]  ;;  %v1284_v47 = vld [vmem:[%s1793_s3 + $0x60] sm:$0xff]  ;;  %s271_s19 = scalar_lea.vmem [#allocation2], %s1030_s13 }
  0x18   : > { %v278_v11 = vld [vmem:[%s276_s17] sm:$0xff]  ;;  %v279_v12 = vld [vmem:[%s276_s17 + $0x8] sm:$0xff]  ;;  %v280_v13 = vld [vmem:[%s276_s17 + $0x10] sm:$0x3]  ;;  %377 = vmatpush.bf16.msra.mxu1 %v1278_v4  ;;  %s964_s20 = sshll.u32 %s271_s19, 4  ;;  %s965_s20 = int_to_ptr.vmem [resolvable:$true] %s964_s20 }
  0x19   : > { %v285_v15 = vmul.f32 %v1351_v3, %v278_v11  ;;  %v286_v16 = vmul.f32 %v1351_v3, %v279_v12  ;;  %v287_v17 = vmul.f32 %v1351_v3, %v280_v13  ;;  %535 = vmatpush.bf16.msra.mxu3 %v1286_v7  ;;  %vm316_vm1 = vcmp.le.s32.totalorder %v310_v14, 16  ;;  %v1290_v48 = vld [vmem:[%s1793_s3 + $0x90] sm:$0xff]  ;;  %v1280_v50 = vld [vmem:[%s1793_s3 + $0x40] sm:$0xff]  ;;  %v1303_v51 = vld [vmem:[%s1793_s3 + $0xf8] sm:$0xff] }
  0x1a   : > { %470 = vmatpush.bf16.msra.mxu2 %v1282_v10  ;;  %v1274_v49 = vld [vmem:[%s1793_s3 + $0x10] sm:$0xff]  ;;  %v1289_v52 = vld [vmem:[%s1793_s3 + $0x88] sm:$0xff]  ;;  %v1299_v54 = vld [vmem:[%s1793_s3 + $0xd8] sm:$0xff] }
  0x1b   : > { %v292_v20 = vadd.f32 %v1352_v9, %v285_v15  ;;  %v293_v21 = vadd.f32 %v1352_v9, %v286_v16  ;;  %v294_v22 = vadd.f32 %v1352_v9, %v287_v17  ;;  %589 = vmatpush.bf16.msra.mxu0 %v1290_v48  ;;  %v1273_v53 = vld [vmem:[%s1793_s3 + $0x8] sm:$0xff]  ;;  %v1288_v55 = vld [vmem:[%s1793_s3 + $0x80] sm:$0xff]  ;;  %v1302_v56 = vld [vmem:[%s1793_s3 + $0xf0] sm:$0xff] }
  0x1c   : > { %378 = vmatpush.bf16.msra.mxu1 %v1277_v18  ;;  %v1272_v57 = vld [vmem:[%s1793_s3] sm:$0xff]  ;;  %v1298_v58 = vld [vmem:[%s1793_s3 + $0xd0] sm:$0xff]  ;;  %v1307_v59 = vld [vmem:[%s1793_s3 + $0x118] sm:$0xff] }
  0x1d   : > { %vm295_vm2 = vcmp.gt.f32.partialorder %v292_v20, 0.0  ;;  %vm296_vm3 = vcmp.gt.f32.partialorder %v293_v21, 0.0  ;;  %vm298_vm4 = vcmp.lt.f32.partialorder %v292_v20, 0.0  ;;  %vm299_vm5 = vcmp.lt.f32.partialorder %v293_v21, 0.0  ;;  %536 = vmatpush.bf16.msra.mxu3 %v1285_v19  ;;  %v1301_v60 = vld [vmem:[%s1793_s3 + $0xe8] sm:$0xff]  ;;  %v1300_v62 = vld [vmem:[%s1793_s3 + $0xe0] sm:$0xff] }
  0x1e   : > { %v301_v25 = vsel %vm298_vm4, -1.0, %v1418_v24  ;;  %v302_v26 = vsel %vm299_vm5, -1.0, %v1418_v24  ;;  %vm297_vm6 = vcmp.gt.f32.partialorder %v294_v22, 0.0  ;;  %vm300_vm7 = vcmp.lt.f32.partialorder %v294_v22, 0.0  ;;  %471 = vmatpush.bf16.msra.mxu2 %v1281_v46  ;;  %v1297_v61 = vld [vmem:[%s1793_s3 + $0xc8] sm:$0xff]  ;;  %v1306_v63 = vld [vmem:[%s1793_s3 + $0x110] sm:$0xff] }
  0x1f   : > { %v304_v27 = vsel %vm295_vm2, 1.0, %v301_v25  ;;  %v305_v28 = vsel %vm296_vm3, 1.0, %v302_v26  ;;  %v303_v29 = vsel %vm300_vm7, -1.0, %v1418_v24  ;;  %590 = vmatpush.bf16.msra.mxu0 %v1289_v52  ;;  %v1296_v0 = vld [vmem:[%s1793_s3 + $0xc0] sm:$0xff]  ;;  %v1305_v1 = vld [vmem:[%s1793_s3 + $0x108] sm:$0xff]  ;;  %v1295_v3 = vld [vmem:[%s1793_s3 + $0xb8] sm:$0xff] }
  0x20   : > { %v320_v30 = vsel %vm311_vm0, %v304_v27, 0.0  ;;  %v306_v31 = vsel %vm297_vm6, 1.0, %v303_v29  ;;  %379 = vmatpush.bf16.msra.mxu1 %v1276_v23  ;;  %v1304_v2 = vld [vmem:[%s1793_s3 + $0x100] sm:$0xff]  ;;  %v1294_v5 = vld [vmem:[%s1793_s3 + $0xb0] sm:$0xff]  ;;  %v1293_v6 = vld [vmem:[%s1793_s3 + $0xa8] sm:$0xff] }
  0x21   : > { %v1551_v32 = vpack.c.bf16 %v305_v28, %v320_v30  ;;  %v322_v33 = vsel %vm316_vm1, %v306_v31, 0.0  ;;  %537 = vmatpush.bf16.msra.mxu3 %v1284_v47  ;;  %v1292_v9 = vld [vmem:[%s1793_s3 + $0xa0] sm:$0xff]  ;;  %v891_v21 = vld [vmem:[%s1796_s6 + $0x78] sm:$0xff]  ;;  %v890_v22 = vld [vmem:[%s1796_s6 + $0x70] sm:$0xff] }
  0x22   : > { %v481_v34 = vpack.c.bf16 %v322_v33, %v322_v33  ;;  %472 = vmatpush.bf16.msra.mxu2 %v1280_v50  ;;  %v1267_v23 = vld [vmem:[%s1796_s6 + $0xf8] sm:$0xff]  ;;  %v889_v26 = vld [vmem:[%s1796_s6 + $0x68] sm:$0xff]  ;;  %v1266_v27 = vld [vmem:[%s1796_s6 + $0xf0] sm:$0xff] }
  0x23   : > { %342 = vrot.lane.b32.xlu0 %v1551_v32, %s1419_s14  ;;  %v492_v35 = vshrl.u32 %v1551_v32, 16  ;;  %v494_v36 = vshll.u32 %v1551_v32, 16  ;;  %v665_v42 = vrot.slane %v1551_v32, 1  ;;  %591 = vmatpush.bf16.msra.mxu0 %v1288_v55  ;;  %v1265_v29 = vld [vmem:[%s1796_s6 + $0xe8] sm:$0xff]  ;;  %v888_v31 = vld [vmem:[%s1796_s6 + $0x60] sm:$0xff]  ;;  %v1259_v52 = vld [vmem:[%s1796_s6 + $0xb8] sm:$0xff] }
  0x24   : > { %v499_v37 = vshll.u32 %v481_v34, 16  ;;  %v666_v43 = vrot.slane %v481_v34, 1  ;;  %417 = vmatpush.bf16.msrb.mxu1 %v1275_v45  ;;  %v1264_v33 = vld [vmem:[%s1796_s6 + $0xe0] sm:$0xff]  ;;  %v887_v34 = vld [vmem:[%s1796_s6 + $0x58] sm:$0xff] }
  0x25   : > { %v496_v38 = vrot.slane %v494_v36, 1  ;;  %753 = vmatpush.bf16.msrb.mxu3 %v1303_v51  ;;  %v1263_v36 = vld [vmem:[%s1796_s6 + $0xd8] sm:$0xff]  ;;  %v884_v46 = vld [vmem:[%s1796_s6 + $0x40] sm:$0xff] }
  0x26   : > { %v501_v39 = vrot.slane %v499_v37, 1  ;;  %v1559_v44 = vsel %vm664_vm9, %v665_v42, %v666_v43  ;;  %699 = vmatpush.bf16.msrb.mxu2 %v1299_v54  ;;  %v886_v37 = vld [vmem:[%s1796_s6 + $0x50] sm:$0xff]  ;;  %v885_v42 = vld [vmem:[%s1796_s6 + $0x48] sm:$0xff]  ;;  %v883_v51 = vld [vmem:[%s1796_s6 + $0x38] sm:$0xff] }
  0x27   : > { %v497_v40 = vor.u32 %v496_v38, %v492_v35  ;;  %807 = vmatpush.bf16.msrb.mxu0 %v1307_v59 }
  0x28   : > { %418 = vmatpush.bf16.msrb.mxu1 %v1274_v49  ;;  %v1260_v49 = vld [vmem:[%s1796_s6 + $0xc0] sm:$0xff] }
  0x29   : > { %v502_v41 = vsel %vm491_vm8, %v497_v40, %v501_v39  ;;  %754 = vmatpush.bf16.msrb.mxu3 %v1302_v56  ;;  %v1262_v39 = vld [vmem:[%s1796_s6 + $0xd0] sm:$0xff] }
  0x2a   : > { %555 = vrot.lane.b32.xlu1 %v502_v41, %s1419_s14  ;;  %609 = vrot.lane.b32.xlu2 %v502_v41, %s1420_s15  ;;  %v1258_v56 = vld [vmem:[%s1796_s6 + $0xb0] sm:$0xff] }
  0x2b   : > { %436 = vrot.lane.b32.xlu0 %v1551_v32, %s1420_s15  ;;  %1123 = vmatmul.msk.bf16.vlgmr.msra.gmra.mxu3 %vm368_vm10, %v502_v41 }
  0x2c   : > { %419 = vmatpush.bf16.msrb.mxu1 %v1273_v53  ;;  %700 = vmatpush.bf16.msrb.mxu2 %v1298_v58  ;;  %v882_v53 = vld [vmem:[%s1796_s6 + $0x30] sm:$0xff]  ;;  %v881_v58 = vld [vmem:[%s1796_s6 + $0x28] sm:$0xff] }
  0x2d   : > { %755 = vmatpush.bf16.msrb.mxu3 %v1301_v60  ;;  %808 = vmatpush.bf16.msrb.mxu0 %v1306_v63  ;;  %v1257_v60 = vld [vmem:[%s1796_s6 + $0xa8] sm:$0xff] }
  0x30   : > { %420 = vmatpush.bf16.msrb.mxu1 %v1272_v57  ;;  %701 = vmatpush.bf16.msrb.mxu2 %v1297_v61 }
  0x31   : > { %756 = vmatpush.bf16.msrb.mxu3 %v1300_v62  ;;  %809 = vmatpush.bf16.msrb.mxu0 %v1305_v1  ;;  %v880_v62 = vld [vmem:[%s1796_s6 + $0x20] sm:$0xff] }
  0x32   : > { %720 = vrot.lane.b32.xlu1 %v1559_v44, %s1419_s14  ;;  %774 = vrot.lane.b32.xlu2 %v1559_v44, %s1420_s15  ;;  %s1269_s14 = sshll.u32 %s1482_s28, 3 }
  0x33   : > { %s962_s17 = scalar_lea.hbm %s1797_s7, %s1269_s14 }
  0x34   : > { %702 = vmatpush.bf16.msrb.mxu2 %v1296_v0  ;;  %s966_s21 = sshll.u32 %s962_s17, 4  ;;  %s967_s21 = int_to_ptr.hbm [resolvable:$true] %s966_s21 }
  0x35   : > { %810 = vmatpush.bf16.msrb.mxu0 %v1304_v2  ;;  %892 = vmatpush.msra.mxu3 %v891_v21  ;;  %v879_v2 = vld [vmem:[%s1796_s6 + $0x18] sm:$0xff]  ;;  %s1368_s23 = sshra.s32 %s967_s21, 4  ;;  %s1369_s23 = int_to_ptr.hbm [resolvable:$true] %s1368_s23 }
  0x36   : > { %s1370_s18 = scalar_lea.hbm %s1369_s23, 8  ;;  %p1375_p0 = scmp.lt.s32.totalorder %s1369_s23, %s1797_s7 }
  0x37   : > { %893 = vmatpush.msra.mxu3 %v890_v22  ;;  %p1371_p11 = scmp.ne.s32.totalorder %s1369_s23, %s1370_s18  ;;  %p1376_p1 = scmp.lt.s32.totalorder %s1374_s8, %s1370_s18 }
  0x39   : > { %894 = vmatpush.msra.mxu3 %v889_v26  ;;  %p1372_p12 = pnand %p1371_p11, %p1499_p5  ;;  %p1377_p2 = por %p1376_p1, %p1375_p0 }
  0x3b   : > { %895 = vmatpush.msra.mxu3 %v888_v31  ;;  %p1373_p13 = pneg %p1372_p12 }
  0x3d   : > { %896 = vmatpush.msra.mxu3 %v887_v34  ;;  %p1378_p3 = pnand %p1377_p2, %p1373_p13 }
  0x3f   : > { %897 = vmatpush.msra.mxu3 %v886_v37 }
  0x41   : > { %898 = vmatpush.msra.mxu3 %v885_v42 }
  0x43   : > { %899 = vmatpush.msra.mxu3 %v884_v46 }
  0x45   : > { %900 = vmatpush.msra.mxu3 %v883_v51 }
  0x47   : > { %901 = vmatpush.msra.mxu3 %v882_v53 }
  0x49   : > { %902 = vmatpush.msra.mxu3 %v881_v58 }
  0x4b   : > { %903 = vmatpush.msra.mxu3 %v880_v62 }
  0x4d   : > { %904 = vmatpush.msra.mxu3 %v879_v2 }
  0x84   : > { %v610_v10 = vpop.permute.xlu2 %609 }
  0x8c   : > { %v775_v12 = vpop.permute.xlu2 %774 }
  0x95   : > { %v343_v4 = vpop.permute.xlu0 %342 }
  0x96   : > { %1056 = vmatmul.msk.bf16.vlgmr.msra.gmra.mxu1 %vm368_vm10, %v343_v4 }
  0x97   : > { %642 = vmatpush.bf16.msra.mxu1 %v1295_v3 }
  0x9b   : > { %643 = vmatpush.bf16.msra.mxu1 %v1294_v5  ;;  %v878_v5 = vld [vmem:[%s1796_s6 + $0x10] sm:$0xff] }
  0x9c   : > { %v556_v7 = vpop.permute.xlu1 %555  ;;  %905 = vmatpush.msra.mxu3 %v878_v5 }
  0x9d   : > { %v437_v8 = vpop.permute.xlu0 %436  ;;  %1148 = vmatmul.msk.bf16.vlgmr.msra.gmra.mxu0 %vm368_vm10, %v556_v7  ;;  %v1353_v7 = vld [vmem:[%s1794_s4] ss:$0 sm:$0xff] }
  0x9e   : > { %1098 = vmatmul.msk.bf16.vlgmr.msra.gmra.mxu2 %vm368_vm10, %v437_v8  ;;  %929 = vmatpush.msra.mxu0 %v1267_v23 }
  0x9f   : > { %644 = vmatpush.bf16.msra.mxu1 %v1293_v6 }
  0xa0   : > { %930 = vmatpush.msra.mxu0 %v1266_v27 }
  0xa2   : > { %931 = vmatpush.msra.mxu0 %v1265_v29 }
  0xa3   : > { %645 = vmatpush.bf16.msra.mxu1 %v1292_v9 }
  0xa4   : > { %v721_v11 = vpop.permute.xlu1 %720  ;;  %932 = vmatpush.msra.mxu0 %v1264_v33 }
  0xa5   : > { %1223 = vmatmul.msk.bf16.vlgmr.msrb.gmra.mxu3 %vm368_vm10, %v721_v11  ;;  %v1250_v11 = vld [vmem:[%s1795_s5 + $0x8] sm:$0xff] }
  0xa6   : > { %1073 = vmatmul.msk.bf16.vlgmr.msrb.gmra.mxu1 %vm368_vm10, %v1551_v32  ;;  %933 = vmatpush.msra.mxu0 %v1263_v36 }
  0xa8   : > { %934 = vmatpush.msra.mxu0 %v1262_v39 }
  0xad   : > { %1248 = vmatmul.msk.bf16.vlgmr.msrb.gmra.mxu0 %vm368_vm10, %v775_v12  ;;  %v825_v12 = vld [vmem:[%s1795_s5] sm:$0xff] }
  0xae   : > { %1198 = vmatmul.msk.bf16.vlgmr.msrb.gmra.mxu2 %vm368_vm10, %v1559_v44  ;;  %v539_v15 = vpop.f32.mrf.mxu3  ;;  %v1261_v44 = vld [vmem:[%s1796_s6 + $0xc8] sm:$0xff] }
  0xaf   : > { %935 = vmatpush.msra.mxu0 %v1261_v44 }
  0xb1   : > { %936 = vmatpush.msra.mxu0 %v1260_v49 }
  0xb3   : > { %937 = vmatpush.msra.mxu0 %v1259_v52 }
  0xb5   : > { %938 = vmatpush.msra.mxu0 %v1258_v56 }
  0xb6   : > { %1173 = vmatmul.msk.bf16.vlgmr.msra.gmra.mxu1 %vm368_vm10, %v610_v10  ;;  %v541_v24 = vpop.f32.mrf.mxu3 }
  0xb7   : > { %939 = vmatpush.msra.mxu0 %v1257_v60 }
 0x113   : > { %v381_v13 = vpop.f32.mrf.mxu1 }
 0x11a   : > { %v593_v17 = vpop.f32.mrf.mxu0 }
 0x11b   : > { %v383_v14 = vpop.f32.mrf.mxu1 }
 0x121   : > { %v474_v16 = vpop.f32.mrf.mxu2 }
 0x122   : > { %v595_v30 = vpop.f32.mrf.mxu0 }
 0x123   : > { %v422_v18 = vpop.f32.mrf.mxu1 }
 0x124   : > { %v423_v19 = vadd.f32 %v422_v18, %v381_v13  ;;  %v1256_v13 = vld [vmem:[%s1796_s6 + $0xa0] sm:$0xff] }
 0x125   : > { %940 = vmatpush.msra.mxu0 %v1256_v13  ;;  %v876_v18 = vld [vmem:[%s1796_s6] sm:$0xff] }
 0x126   : > { %v479_v28 = vadd.f32 %v474_v16, %v423_v19  ;;  %v877_v16 = vld [vmem:[%s1796_s6 + $0x8] sm:$0xff]  ;;  %v1252_v19 = vld [vmem:[%s1796_s6 + $0x80] sm:$0xff] }
 0x127   : > { %906 = vmatpush.msra.mxu3 %v877_v16 }
 0x128   : > { %v544_v35 = vadd.f32 %v539_v15, %v479_v28  ;;  %v758_v45 = vpop.f32.mrf.mxu3  ;;  %v1254_v15 = vld [vmem:[%s1796_s6 + $0x90] sm:$0xff] }
 0x129   : > { %v476_v20 = vpop.f32.mrf.mxu2  ;;  %907 = vmatpush.msra.mxu3 %v876_v18 }
 0x12a   : > { %v598_v43 = vadd.f32 %v593_v17, %v544_v35  ;;  %v812_v50 = vpop.f32.mrf.mxu0  ;;  %v1253_v17 = vld [vmem:[%s1796_s6 + $0x88] sm:$0xff] }
 0x12b   : > { %v424_v25 = vpop.f32.mrf.mxu1 }
 0x12c   : > { %v425_v32 = vadd.f32 %v424_v25, %v383_v14  ;;  %v1255_v14 = vld [vmem:[%s1796_s6 + $0x98] sm:$0xff] }
 0x12d   : > { %941 = vmatpush.msra.mxu0 %v1255_v14 }
 0x12e   : > { %v480_v38 = vadd.f32 %v476_v20, %v425_v32 }
 0x12f   : > { %942 = vmatpush.msra.mxu0 %v1254_v15 }
 0x130   : > { %v545_v48 = vadd.f32 %v541_v24, %v480_v38  ;;  %v760_v1 = vpop.f32.mrf.mxu3 }
 0x131   : > { %v704_v40 = vpop.f32.mrf.mxu2  ;;  %943 = vmatpush.msra.mxu0 %v1253_v17 }
 0x132   : > { %v599_v55 = vadd.f32 %v595_v30, %v545_v48  ;;  %v814_v4 = vpop.f32.mrf.mxu0 }
 0x133   : > { %v647_v41 = vpop.f32.mrf.mxu1  ;;  %944 = vmatpush.msra.mxu0 %v1252_v19 }
 0x134   : > { %v652_v47 = vadd.f32 %v647_v41, %v598_v43 }
 0x136   : > { %v709_v54 = vadd.f32 %v704_v40, %v652_v47 }
 0x138   : > { %v763_v63 = vadd.f32 %v758_v45, %v709_v54 }
 0x139   : > { %v706_v61 = vpop.f32.mrf.mxu2 }
 0x13a   : > { %v817_v8 = vadd.f32 %v812_v50, %v763_v63 }
 0x13b   : > { %v649_v57 = vpop.f32.mrf.mxu1 }
 0x13c   : > { %v653_v59 = vadd.f32 %v649_v57, %v599_v55  ;;  %v823_v10 = vadd.f32 %v1353_v7, %v817_v8 }
 0x13e   : > { %v710_v0 = vadd.f32 %v706_v61, %v653_v59 }
 0x140   : > { %v764_v3 = vadd.f32 %v760_v1, %v710_v0 }
 0x142   : > { %v818_v6 = vadd.f32 %v814_v4, %v764_v3 }
 0x144   : > { %v824_v9 = vadd.f32 %v1353_v7, %v818_v6 }
 0x146   : > { %844 = vmatpush.msrb.mxu1 %v824_v9  ;;  %869 = vmatpush.msra.mxu2 %v824_v9 }
 0x148   : > { %845 = vmatpush.msrb.mxu1 %v823_v10  ;;  %870 = vmatpush.msra.mxu2 %v823_v10 }
 0x149   : > { %1251 = vmatmul.msk.f32.vlgmr.msra.gmra.mxu2 %vm826_vm11, %v1250_v11  ;;  %1249 = vmatmul.msk.f32.vlgmr.msrb.gmra.mxu1 %vm826_vm11, %v825_v12 }
 0x1c6   : > { %v847_v20 = vpop.f32.mrf.mxu1 }
 0x1cc   : > { %v872_v21 = vpop.f32.mrf.mxu2 }
 0x1cd   : > { %v875_v22 = vmax.f32 %v847_v20, %v872_v21 }
 0x1cf   : > { %908 = vmatmul.f32.vlgmr.msra.gmra.mxu3 %v875_v22  ;;  %945 = vmatmul.f32.vlgmr.msra.gmra.mxu0 %v875_v22 }
 0x24c   : > { %v946_v24 = vpop.f32.mrf.mxu0 }
 0x252   : > { %v909_v23 = vpop.f32.mrf.mxu3 }
 0x253   : > { %v949_v25 = vmax.f32 %v909_v23, %v946_v24 }
 0x255   : > { %950 = vst.msk [vmem:[%s271_s19] sm:$0xff] %vm368_vm10, %v949_v25 }
 0x256   : > { %1381 = shalt.err (!%p1378_p3)
}
 0x257   : > { %1309 = dma.vmem_to_hbm [thread:$0]  (%p1499_p5), %s965_s20, 128, %s967_s21, %s952_s22  }
 0x258 PF: > { %p1315_p4 = scmp.ge.s32.totalorder %s1416_s27, 2  ;;  %s978_s9 = sand.u32 1, %s1404_s24  }
 0x259   : > { %s979_s15 = scalar_lea.sflag [#allocation3], %s978_s9 }
 0x25a   : > { %p1312_p7 = pnand %p1315_p4, %p1503_p6 }
 0x25c   : > { %p1313_p8 = pneg %p1312_p7 }
 0x25e   : > { %1399 = dma.done.wait (%p1313_p8), %s979_s15, 128  }
 0x25f   : > { %1401 = vsyncadd (%p1313_p8), %s979_s15, 4294967168  ;;  %p17_p9 = scmp.ge.s32.totalorder %s1486_s30, 4   ;;  %s1800_s24 = smov %s1408_s25 }
 0x260   : > { %s1801_s25 = smov %s1412_s26  ;;  %s1802_s26 = smov %s1497_s10 }
 0x261   : > { %s1803_s27 = smov %s1486_s30  ;;  %19 = sbr.rel (!%p17_p9) target bundleno = 3 (0x3), region = 93 }
 0x266   :  { %985 = vsyncpa [#allocation3], 1 }
 0x267   :  { %987 = vsyncpa [#allocation3 + $0x1], 1 }

</bundles_post_ra>
